<compile_context>
chip_gen: v6e
topology: v6e:2x2x1
jax: 0.10.0
libtpu: 0.0.40
codegen_flags: <defaults>
</compile_context>

<pallas_src>
import functools

import jax
import jax.numpy as jnp
from jax.experimental import pallas as pl
from jax.experimental.pallas import tpu as pltpu

LANE = 128


def _round_up(n, m):
    return ((n + m - 1) // m) * m


def _mlp_kernel(x_ref, w1_ref, b1_ref, w2_ref, b2_ref, w3_ref, b3_ref, o_ref):
    # fc1 + ReLU (bf16 operands, f32 accumulation on the MXU; x cast on the VPU)
    x = x_ref[...].astype(w1_ref.dtype)
    h1 = jnp.dot(x, w1_ref[...], preferred_element_type=jnp.float32) + b1_ref[...]
    h1 = jnp.maximum(h1, 0.0).astype(w2_ref.dtype)
    # fc2 + ReLU
    h2 = jnp.dot(h1, w2_ref[...], preferred_element_type=jnp.float32) + b2_ref[...]
    h2 = jnp.maximum(h2, 0.0).astype(w3_ref.dtype)
    # fc3 (lane-padded to 128 output columns; padded cols have zero weights/bias)
    o_ref[...] = (
        jnp.dot(h2, w3_ref[...], preferred_element_type=jnp.float32) + b3_ref[...]
    ).astype(o_ref.dtype)


def prepare_params(params, weight_dtype=jnp.bfloat16):
    """One-time conversion of PyTorch-convention params (call OUTSIDE the hot path).

    Transposes weights to (in, out), casts to bf16, pads fc3 to a 128-lane
    width, keeps biases in f32 shaped (1, out).  `num_classes` stays a Python
    int so it remains static under jit.
    """
    num_classes = int(params["w3"].shape[0])
    nc_pad = max(_round_up(num_classes, LANE), LANE)

    w1 = jnp.asarray(params["w1"].T, weight_dtype)          # (in, 512)
    w2 = jnp.asarray(params["w2"].T, weight_dtype)          # (512, 256)
    w3 = jnp.zeros((params["w3"].shape[1], nc_pad), weight_dtype)
    w3 = w3.at[:, :num_classes].set(jnp.asarray(params["w3"].T, weight_dtype))

    b1 = jnp.asarray(params["b1"], jnp.float32).reshape(1, -1)
    b2 = jnp.asarray(params["b2"], jnp.float32).reshape(1, -1)
    b3 = jnp.zeros((1, nc_pad), jnp.float32)
    b3 = b3.at[:, :num_classes].set(jnp.asarray(params["b3"], jnp.float32))

    return {
        "w1": w1, "b1": b1, "w2": w2, "b2": b2, "w3": w3, "b3": b3,
        "num_classes": num_classes,
    }


@functools.partial(jax.jit, static_argnames=("num_classes", "batch_tile"))
def _forward_jit(x, arrays, *, num_classes, batch_tile):
    w1, b1, w2, b2, w3, b3 = arrays
    B, in_features = x.shape
    nc_pad = w3.shape[1]

    w_itemsize = jnp.dtype(w1.dtype).itemsize
    x_itemsize = jnp.dtype(x.dtype).itemsize
    cost = pl.CostEstimate(
        flops=2 * B * (in_features * w1.shape[1]
                       + w2.shape[0] * w2.shape[1]
                       + w3.shape[0] * nc_pad),
        transcendentals=0,
        bytes_accessed=(w1.size + w2.size + w3.size) * w_itemsize
        + (b1.size + b2.size + b3.size) * 4
        + x.size * x_itemsize
        + B * nc_pad * 2,                      # bf16 output writeback
    )

    if B <= batch_tile:
        # Tiny batch: one grid-less fused call; everything fits VMEM easily.
        out = pl.pallas_call(
            _mlp_kernel,
            out_shape=jax.ShapeDtypeStruct((B, nc_pad), jnp.bfloat16),
            in_specs=[pl.BlockSpec(memory_space=pltpu.MemorySpace.VMEM)] * 7,
            out_specs=pl.BlockSpec(memory_space=pltpu.MemorySpace.VMEM),
            cost_estimate=cost,
        )(x, w1, b1, w2, b2, w3, b3)
        return out[:, :num_classes].astype(jnp.float32)

    # Large batch: stream x/out over a 1-D batch grid (double-buffered by
    # Pallas); weights/biases use a constant index_map so they stay resident
    # in VMEM across all grid steps and are fetched from HBM exactly once.
    # Shrink the tile (multiples of 8 preserved) until the grid has >=2 steps
    # so both v7x TensorCores get work under dimension_semantics=("parallel",).
    tile = batch_tile
    while tile > 256 and pl.cdiv(B, tile) < 2:
        tile //= 2
    grid_len = pl.cdiv(B, tile)   # last tile may be partial: OOB reads are
                                  # discarded garbage rows, OOB writes masked.

    def resident(shape):
        return pl.BlockSpec(shape, lambda i: (0, 0))

    out = pl.pallas_call(
        _mlp_kernel,
        out_shape=jax.ShapeDtypeStruct((B, nc_pad), jnp.bfloat16),
        grid=(grid_len,),
        in_specs=[
            pl.BlockSpec((tile, in_features), lambda i: (i, 0)),
            resident(w1.shape), resident(b1.shape),
            resident(w2.shape), resident(b2.shape),
            resident(w3.shape), resident(b3.shape),
        ],
        out_specs=pl.BlockSpec((tile, nc_pad), lambda i: (i, 0)),
        compiler_params=pltpu.CompilerParams(
            dimension_semantics=("parallel",),   # v7x: 2 TCs split the batch
            vmem_limit_bytes=48 * 1024 * 1024,   # < 64 MiB v7x physical VMEM
        ),
        cost_estimate=cost,
    )(x, w1, b1, w2, b2, w3, b3)
    return out[:, :num_classes].astype(jnp.float32)


def custom_classifier_forward(x, prepared, *, batch_tile=1024):
    """x: (B, in_features) f32. prepared: output of prepare_params()."""
    num_classes = int(prepared["num_classes"])               # static Python int
    arrays = tuple(prepared[k] for k in ("w1", "b1", "w2", "b2", "w3", "b3"))
    return _forward_jit(x, arrays, num_classes=num_classes, batch_tile=batch_tile)


def init_params(key, in_features, num_classes):
    """Deterministic PyTorch-style init: U(-1/sqrt(fan_in), 1/sqrt(fan_in))."""
    keys = jax.random.split(key, 6)

    def linear(kw, kb, fan_in, fan_out):
        bound = 1.0 / jnp.sqrt(fan_in)
        w = jax.random.uniform(kw, (fan_out, fan_in), jnp.float32, -bound, bound)
        b = jax.random.uniform(kb, (fan_out,), jnp.float32, -bound, bound)
        return w, b

    w1, b1 = linear(keys[0], keys[1], in_features, 512)
    w2, b2 = linear(keys[2], keys[3], 512, 256)
    w3, b3 = linear(keys[4], keys[5], 256, num_classes)
    return {"w1": w1, "b1": b1, "w2": w2, "b2": b2, "w3": w3, "b3": b3}


def reference_forward_f32(x, params):
    h1 = jnp.maximum(x @ params["w1"].T + params["b1"], 0.0)
    h2 = jnp.maximum(h1 @ params["w2"].T + params["b2"], 0.0)
    return h2 @ params["w3"].T + params["b3"]


def reference_forward_bf16(x, params):
    """Emulates the kernel's precision: bf16 operands, f32 acc, bf16 output."""
    def r(a):  # bf16 rounding
        return a.astype(jnp.bfloat16).astype(jnp.float32)

    xb = r(x)
    h1 = jnp.maximum(xb @ r(params["w1"].T) + params["b1"], 0.0)
    h2 = jnp.maximum(r(h1) @ r(params["w2"].T) + params["b2"], 0.0)
    return r(r(h2) @ r(params["w3"].T) + params["b3"])


if __name__ == "__main__":
    key = jax.random.PRNGKey(0)
    k_x, k_xl, k_xt, k_p = jax.random.split(key, 4)

    batch = 8
    in_features = 512   # e.g. resnet18 model.fc.in_features
    num_classes = 3

    params = init_params(k_p, in_features, num_classes)
    prepared = prepare_params(params)           # one-time: transpose/cast/pad

    # --- small batch: grid-less fused path ---
    x = jax.random.normal(k_x, (batch, in_features), dtype=jnp.float32)
    out = jax.block_until_ready(custom_classifier_forward(x, prepared))
    assert out.shape == (batch, num_classes)
    assert out.dtype == jnp.float32
    ref_bf16 = reference_forward_bf16(x, params)
    ref_f32 = reference_forward_f32(x, params)
    assert jnp.allclose(out, ref_bf16, atol=2e-2, rtol=2e-2), "mismatch vs bf16 reference"
    assert jnp.allclose(out, ref_f32, atol=8e-2, rtol=8e-2), "mismatch vs f32 reference"

    # --- large batch: 1-D batch grid (2 steps -> both v7x TCs), weights resident ---
    big_batch = 2048
    x_big = jax.random.normal(k_xl, (big_batch, in_features), dtype=jnp.float32)
    out_big = jax.block_until_ready(custom_classifier_forward(x_big, prepared))
    assert out_big.shape == (big_batch, num_classes)
    ref_big = reference_forward_bf16(x_big, params)
    assert jnp.allclose(out_big, ref_big, atol=2e-2, rtol=2e-2), "batched mismatch"

    # --- non-divisible batch: partial last tile, no jnp.pad copy of x ---
    tail_batch = 1288
    x_tail = jax.random.normal(k_xt, (tail_batch, in_features), dtype=jnp.float32)
    out_tail = jax.block_until_ready(custom_classifier_forward(x_tail, prepared))
    assert out_tail.shape == (tail_batch, num_classes)
    ref_tail = reference_forward_bf16(x_tail, params)
    assert jnp.allclose(out_tail, ref_tail, atol=2e-2, rtol=2e-2), "tail-tile mismatch"

    print("KERNEL_OK")
</pallas_src>

<mosaic_0001>
module attributes {stable_mosaic.version = 11 : i64} {
  func.func @_mlp_kernel(%arg0: memref<8x512xf32, #tpu.memory_space<vmem>>, %arg1: memref<512x512xbf16, #tpu.memory_space<vmem>>, %arg2: memref<1x512xf32, #tpu.memory_space<vmem>>, %arg3: memref<512x256xbf16, #tpu.memory_space<vmem>>, %arg4: memref<1x256xf32, #tpu.memory_space<vmem>>, %arg5: memref<256x128xbf16, #tpu.memory_space<vmem>>, %arg6: memref<1x128xf32, #tpu.memory_space<vmem>>, %arg7: memref<8x128xbf16, #tpu.memory_space<vmem>>) attributes {dimension_semantics = [], scalar_prefetch = 0 : i64, scratch_operands = 0 : i64, tpu.core_type = #tpu.core_type<tc>} {
    %c0 = arith.constant 0 : index
    %c0_0 = arith.constant 0 : index
    %0 = vector.load %arg0[%c0, %c0_0] : memref<8x512xf32, #tpu.memory_space<vmem>>, vector<8x512xf32>
    %1 = arith.truncf %0 : vector<8x512xf32> to vector<8x512xbf16>
    %c0_1 = arith.constant 0 : index
    %c0_2 = arith.constant 0 : index
    %2 = vector.load %arg1[%c0_1, %c0_2] : memref<512x512xbf16, #tpu.memory_space<vmem>>, vector<512x512xbf16>
    %cst = arith.constant dense<0.000000e+00> : vector<8x512xf32>
    %3 = tpu.matmul %1, %2, %cst {dimension_numbers = #tpu.dot_dimension_numbers<[1], [0], [0], [1], [0, 0, 1, 1], [], []>} : vector<8x512xbf16>, vector<512x512xbf16>, vector<8x512xf32> -> vector<8x512xf32>
    %c0_3 = arith.constant 0 : index
    %c0_4 = arith.constant 0 : index
    %4 = vector.load %arg2[%c0_3, %c0_4] : memref<1x512xf32, #tpu.memory_space<vmem>>, vector<1x512xf32>
    %5 = vector.broadcast %4 : vector<1x512xf32> to vector<8x512xf32>
    %6 = arith.addf %3, %5 : vector<8x512xf32>
    %cst_5 = arith.constant 0.000000e+00 : f32
    %7 = vector.broadcast %cst_5 : f32 to vector<8x512xf32>
    %8 = arith.maximumf %6, %7 : vector<8x512xf32>
    %9 = arith.truncf %8 : vector<8x512xf32> to vector<8x512xbf16>
    %c0_6 = arith.constant 0 : index
    %c0_7 = arith.constant 0 : index
    %10 = vector.load %arg3[%c0_6, %c0_7] : memref<512x256xbf16, #tpu.memory_space<vmem>>, vector<512x256xbf16>
    %cst_8 = arith.constant dense<0.000000e+00> : vector<8x256xf32>
    %11 = tpu.matmul %9, %10, %cst_8 {dimension_numbers = #tpu.dot_dimension_numbers<[1], [0], [0], [1], [0, 0, 1, 1], [], []>} : vector<8x512xbf16>, vector<512x256xbf16>, vector<8x256xf32> -> vector<8x256xf32>
    %c0_9 = arith.constant 0 : index
    %c0_10 = arith.constant 0 : index
    %12 = vector.load %arg4[%c0_9, %c0_10] : memref<1x256xf32, #tpu.memory_space<vmem>>, vector<1x256xf32>
    %13 = vector.broadcast %12 : vector<1x256xf32> to vector<8x256xf32>
    %14 = arith.addf %11, %13 : vector<8x256xf32>
    %cst_11 = arith.constant 0.000000e+00 : f32
    %15 = vector.broadcast %cst_11 : f32 to vector<8x256xf32>
    %16 = arith.maximumf %14, %15 : vector<8x256xf32>
    %17 = arith.truncf %16 : vector<8x256xf32> to vector<8x256xbf16>
    %c0_12 = arith.constant 0 : index
    %c0_13 = arith.constant 0 : index
    %18 = vector.load %arg5[%c0_12, %c0_13] : memref<256x128xbf16, #tpu.memory_space<vmem>>, vector<256x128xbf16>
    %cst_14 = arith.constant dense<0.000000e+00> : vector<8x128xf32>
    %19 = tpu.matmul %17, %18, %cst_14 {dimension_numbers = #tpu.dot_dimension_numbers<[1], [0], [0], [1], [0, 0, 1, 1], [], []>} : vector<8x256xbf16>, vector<256x128xbf16>, vector<8x128xf32> -> vector<8x128xf32>
    %c0_15 = arith.constant 0 : index
    %c0_16 = arith.constant 0 : index
    %20 = vector.load %arg6[%c0_15, %c0_16] : memref<1x128xf32, #tpu.memory_space<vmem>>, vector<1x128xf32>
    %21 = vector.broadcast %20 : vector<1x128xf32> to vector<8x128xf32>
    %22 = arith.addf %19, %21 : vector<8x128xf32>
    %23 = arith.truncf %22 : vector<8x128xf32> to vector<8x128xbf16>
    %c0_17 = arith.constant 0 : index
    %c0_18 = arith.constant 0 : index
    %24 = vector.load %arg7[%c0_17, %c0_18] : memref<8x128xbf16, #tpu.memory_space<vmem>>, vector<8x128xbf16>
    tpu.vector_store %arg7[%c0_17, %c0_18], %23 {strides = array<i32>} : memref<8x128xbf16, #tpu.memory_space<vmem>>, vector<8x128xbf16>,
    return
  }
}

</mosaic_0001>

<bundles_post_ra>
// kernel: _forward_jit.1
= control target key start
LH: loop header
LB: loop body
LE: loop exit
PB: predicated region body
PF: predicated region fallthrough
CT: control target
= control target key end

     0   :  { %12 = vsyncpa [#allocation3], 0  ;;  %s2480_s0 = inlined_call_operand.hbm [shape: f32[8,512], index: 0, kind: input, shape index: {}]   ;;  %s2481_s1 = inlined_call_operand.hbm [shape: bf16[512,512], index: 1, kind: input, shape index: {}]   ;;  %s2482_s2 = inlined_call_operand.hbm [shape: f32[1,512], index: 2, kind: input, shape index: {}]   ;;  %s2483_s3 = inlined_call_operand.hbm [shape: bf16[512,256], index: 3, kind: input, shape index: {}]   ;;  %s2484_s4 = inlined_call_operand.vmem [shape: f32[1,256], index: 4, kind: input, shape index: {}]   ;;  %s2485_s5 = inlined_call_operand.hbm [shape: bf16[256,128], index: 5, kind: input, shape index: {}]   ;;  %s2486_s6 = inlined_call_operand.vmem [shape: f32[1,128], index: 6, kind: input, shape index: {}]   ;;  %s2487_s7 = inlined_call_operand.vmem [shape: bf16[8,128], index: 7, kind: output, shape index: {}]  }
   0x1   :  { %13 = vsyncpa [#allocation5], 0 }
   0x2   :  { %14 = vsyncpa [#allocation8], 0  ;;  %s2379_s24 = smov [#allocation4]  }
   0x3   :  { %s30_s25 = sshll.u32 %s2379_s24, 4  ;;  %s31_s25 = int_to_ptr.vmem [resolvable:$true] %s30_s25 }
   0x4   :  { %s2281_s26 = scalar_lea.vmem %s31_s25, 16384  ;;  %p2286_p1 = scmp.lt.s32.totalorder %s31_s25, %s31_s25 }
   0x5   :  { %p2282_p0 = scmp.ne.s32.totalorder %s31_s25, %s2281_s26  ;;  %p2287_p2 = scmp.lt.s32.totalorder %s2281_s26, %s2281_s26 }
   0x7   :  { %p2288_p3 = por %p2287_p2, %p2286_p1 }
   0x9   :  { %p2289_p4 = pnand %p2288_p3, %p2282_p0 }
   0xb   :  { %2292 = shalt.err (!%p2289_p4)
}
   0xc   :  { %s2380_s27 = smov 256   ;;  %s2381_s28 = smov 16  }
   0xd   :  { %36 = dma.hbm_to_vmem [thread:$0]  %s2481_s1, 16384, %s31_s25, [#allocation5], %s2380_s27, %s2380_s27, %s2381_s28  }
   0xe   :  { %s2382_s8 = smov [#allocation7]  }
   0xf   :  { %s52_s9 = sshll.u32 %s2382_s8, 4  ;;  %s53_s9 = int_to_ptr.vmem [resolvable:$true] %s52_s9 }
  0x10   :  { %s2301_s10 = scalar_lea.vmem %s53_s9, 8192  ;;  %p2306_p6 = scmp.lt.s32.totalorder %s53_s9, %s53_s9 }
  0x11   :  { %p2302_p5 = scmp.ne.s32.totalorder %s53_s9, %s2301_s10  ;;  %p2307_p7 = scmp.lt.s32.totalorder %s2301_s10, %s2301_s10 }
  0x13   :  { %p2308_p8 = por %p2307_p7, %p2306_p6 }
  0x15   :  { %p2309_p9 = pnand %p2308_p8, %p2302_p5 }
  0x17   :  { %2312 = shalt.err (!%p2309_p9)
}
  0x18   :  { %s2383_s11 = smov 128   ;;  %s2384_s12 = smov 8  }
  0x19   :  { %58 = dma.hbm_to_vmem [thread:$0]  %s2483_s3, 8192, %s53_s9, [#allocation8], %s2383_s11, %s2383_s11, %s2384_s12  }
  0x1a   :  { %s2385_s15 = smov [#allocation2]   ;;  %s2386_s17 = smov [#allocation6]  }
  0x1b   :  { %s21_s16 = sshll.u32 %s2385_s15, 4  ;;  %s43_s1 = sshll.u32 %s2386_s17, 4  ;;  %s22_s16 = int_to_ptr.vmem [resolvable:$true] %s21_s16  ;;  %s44_s1 = int_to_ptr.vmem [resolvable:$true] %s43_s1 }
  0x1c   :  { %s2321_s18 = scalar_lea.vmem %s22_s16, 512  ;;  %p2326_p11 = scmp.lt.s32.totalorder %s22_s16, %s22_s16 }
  0x1d   :  { %p2322_p10 = scmp.ne.s32.totalorder %s22_s16, %s2321_s18  ;;  %p2327_p12 = scmp.lt.s32.totalorder %s2321_s18, %s2321_s18 }
  0x1f   :  { %p2328_p13 = por %p2327_p12, %p2326_p11 }
  0x21   :  { %p2329_p0 = pnand %p2328_p13, %p2322_p10 }
  0x23   :  { %2332 = shalt.err (!%p2329_p0)
}
  0x24   :  { %24 = dma.hbm_to_vmem [thread:$0]  %s2480_s0, 512, %s22_s16, [#allocation3]  }
  0x25   :  { %s2341_s21 = scalar_lea.vmem %s44_s1, 64  ;;  %p2346_p2 = scmp.lt.s32.totalorder %s44_s1, %s44_s1 }
  0x26   :  { %p2342_p1 = scmp.ne.s32.totalorder %s44_s1, %s2341_s21  ;;  %p2347_p3 = scmp.lt.s32.totalorder %s2341_s21, %s2341_s21 }
  0x28   :  { %p2348_p4 = por %p2347_p3, %p2346_p2 }
  0x2a   :  { %p2349_p5 = pnand %p2348_p4, %p2342_p1 }
  0x2c   :  { %2352 = shalt.err (!%p2349_p5)
}
  0x2d   :  { %46 = dma.hbm_to_vmem [thread:$0]  %s2482_s2, 64, %s44_s1, [#allocation5]  }
  0x2e   :  { %s2387_s23 = smov [#allocation9]  }
  0x2f   :  { %s66_s24 = sshll.u32 %s2387_s23, 4  ;;  %s67_s24 = int_to_ptr.vmem [resolvable:$true] %s66_s24 }
  0x30   :  { %s2361_s25 = scalar_lea.vmem %s67_s24, 2048  ;;  %p2366_p7 = scmp.lt.s32.totalorder %s67_s24, %s67_s24 }
  0x31   :  { %p2362_p6 = scmp.ne.s32.totalorder %s67_s24, %s2361_s25  ;;  %p2367_p8 = scmp.lt.s32.totalorder %s2361_s25, %s2361_s25 }
  0x33   :  { %p2368_p9 = por %p2367_p8, %p2366_p7 }
  0x35   :  { %p2369_p10 = pnand %p2368_p9, %p2362_p6 }
  0x37   :  { %2372 = shalt.err (!%p2369_p10)
}
  0x38   :  { %s2388_s0 = smov 64   ;;  %s2389_s26 = smov 4  }
  0x39   :  { %72 = dma.hbm_to_vmem [thread:$0]  %s2485_s5, 2048, %s67_s24, [#allocation8], %s2388_s0, %s2388_s0, %s2389_s26  }
  0x3a   :  { %2373 = dma.done.wait [#allocation3], 512  }
  0x3b   :  { %2374 = vsyncadd [#allocation3], 4294966784 }
  0x3c   :  { %2375 = dma.done.wait [#allocation5], 16448  }
  0x3d   :  { %2376 = vsyncadd [#allocation5], 4294950848 }
  0x3e   :  { %2377 = dma.done.wait [#allocation8], 10240  }
  0x3f   :  { %2378 = vsyncadd [#allocation8], 4294957056  ;;  %v1969_v0 = vld [vmem:[#allocation4 + $0xe4] ss:$16 sps:$4 sm:$0xff]   ;;  %v1973_v2 = vld [vmem:[#allocation4 + $0xe0] ss:$16 sps:$4 sm:$0xff]  }
  0x40   :  { %v1971_v1 = vld [vmem:[#allocation4 + $0x2e4] ss:$16 sps:$4 sm:$0xff]   ;;  %889 = vmatprep.subr.bf16.mxu0 %v1969_v0  ;;  %v1974_v3 = vld [vmem:[#allocation4 + $0x2e0] ss:$16 sps:$4 sm:$0xff]   ;;  %v92_v46 = vld [vmem:[#allocation2 + $0x8] sm:$0xff] }
  0x41   :  { %930 = vmatprep.subr.bf16.mxu1 %v1971_v1  ;;  %v1975_v4 = vld [vmem:[#allocation4 + $0xc4] ss:$16 sps:$4 sm:$0xff]   ;;  %890 = vmatpush1.bf16.msra.mxu0 %v1973_v2  ;;  %v1979_v6 = vld [vmem:[#allocation4 + $0xc0] ss:$16 sps:$4 sm:$0xff]   ;;  %v2445_v49 = vpack.c.bf16 %v92_v46, %v92_v46  ;;  %v94_v50 = vld [vmem:[#allocation2 + $0x18] sm:$0xff] }
  0x42   :  { %931 = vmatpush1.bf16.msra.mxu1 %v1974_v3  ;;  %v1977_v5 = vld [vmem:[#allocation4 + $0x2c4] ss:$16 sps:$4 sm:$0xff]   ;;  %891 = vmatprep.subr.bf16.mxu0 %v1975_v4  ;;  %v1980_v7 = vld [vmem:[#allocation4 + $0x2c0] ss:$16 sps:$4 sm:$0xff]   ;;  %v98_v52 = vpack.c.bf16 %v94_v50, %v94_v50  ;;  %v2119_v46 = vld [vmem:[#allocation4 + $0x1c8] ss:$16 sps:$4 sm:$0xff]  }
  0x43   :  { %932 = vmatprep.subr.bf16.mxu1 %v1977_v5  ;;  %v1981_v8 = vld [vmem:[#allocation4 + $0xa4] ss:$16 sps:$4 sm:$0xff]   ;;  %v1985_v10 = vld [vmem:[#allocation4 + $0xa0] ss:$16 sps:$4 sm:$0xff]   ;;  %921 = vmatprep.mubr.bf16.mxu0 %v2445_v49  ;;  %v2125_v50 = vld [vmem:[#allocation4 + $0x1a8] ss:$16 sps:$4 sm:$0xff]  }
  0x44   :  { %v1983_v9 = vld [vmem:[#allocation4 + $0x2a4] ss:$16 sps:$4 sm:$0xff]   ;;  %v1986_v11 = vld [vmem:[#allocation4 + $0x2a0] ss:$16 sps:$4 sm:$0xff]   ;;  %962 = vmatprep.mubr.bf16.mxu1 %v98_v52 }
  0x45   :  { %892 = vmatpush1.bf16.msra.mxu0 %v1979_v6  ;;  %v1987_v12 = vld [vmem:[#allocation4 + $0x84] ss:$16 sps:$4 sm:$0xff]   ;;  %v1991_v14 = vld [vmem:[#allocation4 + $0x80] ss:$16 sps:$4 sm:$0xff]   ;;  %v2067_v6 = vld [vmem:[#allocation4 + $0xec] ss:$16 sps:$4 sm:$0xff]  }
  0x46   :  { %933 = vmatpush1.bf16.msra.mxu1 %v1980_v7  ;;  %893 = vmatprep.subr.bf16.mxu0 %v1981_v8  ;;  %v1989_v13 = vld [vmem:[#allocation4 + $0x284] ss:$16 sps:$4 sm:$0xff]   ;;  %v1992_v15 = vld [vmem:[#allocation4 + $0x280] ss:$16 sps:$4 sm:$0xff]   ;;  %v2070_v7 = vld [vmem:[#allocation4 + $0x2ec] ss:$16 sps:$4 sm:$0xff]  }
  0x47   :  { %934 = vmatprep.subr.bf16.mxu1 %v1983_v9  ;;  %v1993_v16 = vld [vmem:[#allocation4 + $0x64] ss:$16 sps:$4 sm:$0xff]   ;;  %v1997_v18 = vld [vmem:[#allocation4 + $0x60] ss:$16 sps:$4 sm:$0xff]  }
  0x48   :  { %v1995_v17 = vld [vmem:[#allocation4 + $0x264] ss:$16 sps:$4 sm:$0xff]   ;;  %v1998_v19 = vld [vmem:[#allocation4 + $0x260] ss:$16 sps:$4 sm:$0xff]  }
  0x49   :  { %894 = vmatpush1.bf16.msra.mxu0 %v1985_v10  ;;  %v1999_v20 = vld [vmem:[#allocation4 + $0x44] ss:$16 sps:$4 sm:$0xff]   ;;  %v2003_v22 = vld [vmem:[#allocation4 + $0x40] ss:$16 sps:$4 sm:$0xff]   ;;  %v2065_v10 = vld [vmem:[#allocation4 + $0xe8] ss:$16 sps:$4 sm:$0xff]  }
  0x4a   :  { %935 = vmatpush1.bf16.msra.mxu1 %v1986_v11  ;;  %895 = vmatprep.subr.bf16.mxu0 %v1987_v12  ;;  %v2001_v21 = vld [vmem:[#allocation4 + $0x244] ss:$16 sps:$4 sm:$0xff]   ;;  %v2004_v23 = vld [vmem:[#allocation4 + $0x240] ss:$16 sps:$4 sm:$0xff]   ;;  %v2068_v11 = vld [vmem:[#allocation4 + $0x2e8] ss:$16 sps:$4 sm:$0xff]  }
  0x4b   :  { %936 = vmatprep.subr.bf16.mxu1 %v1989_v13  ;;  %v2005_v24 = vld [vmem:[#allocation4 + $0x24] ss:$16 sps:$4 sm:$0xff]   ;;  %v2009_v26 = vld [vmem:[#allocation4 + $0x20] ss:$16 sps:$4 sm:$0xff]   ;;  %v2073_v12 = vld [vmem:[#allocation4 + $0xcc] ss:$16 sps:$4 sm:$0xff]  }
  0x4c   :  { %v2007_v25 = vld [vmem:[#allocation4 + $0x224] ss:$16 sps:$4 sm:$0xff]   ;;  %v2010_v27 = vld [vmem:[#allocation4 + $0x220] ss:$16 sps:$4 sm:$0xff]   ;;  %v2076_v13 = vld [vmem:[#allocation4 + $0x2cc] ss:$16 sps:$4 sm:$0xff]  }
  0x4d   :  { %896 = vmatpush1.bf16.msra.mxu0 %v1991_v14  ;;  %v2011_v28 = vld [vmem:[#allocation4 + $0x4] ss:$16 sps:$4 sm:$0xff]   ;;  %v2015_v30 = vld [vmem:[#allocation4] ss:$16 sps:$4 sm:$0xff]   ;;  %v2071_v14 = vld [vmem:[#allocation4 + $0xc8] ss:$16 sps:$4 sm:$0xff]  }
  0x4e   :  { %937 = vmatpush1.bf16.msra.mxu1 %v1992_v15  ;;  %897 = vmatprep.subr.bf16.mxu0 %v1993_v16  ;;  %v2013_v29 = vld [vmem:[#allocation4 + $0x204] ss:$16 sps:$4 sm:$0xff]   ;;  %v2016_v31 = vld [vmem:[#allocation4 + $0x200] ss:$16 sps:$4 sm:$0xff]   ;;  %v2074_v15 = vld [vmem:[#allocation4 + $0x2c8] ss:$16 sps:$4 sm:$0xff]  }
  0x4f   :  { %938 = vmatprep.subr.bf16.mxu1 %v1995_v17  ;;  %v2017_v32 = vld [vmem:[#allocation4 + $0x1e4] ss:$16 sps:$4 sm:$0xff]   ;;  %v2021_v34 = vld [vmem:[#allocation4 + $0x1e0] ss:$16 sps:$4 sm:$0xff]   ;;  %v2079_v16 = vld [vmem:[#allocation4 + $0xac] ss:$16 sps:$4 sm:$0xff]  }
  0x50   :  { %v2019_v33 = vld [vmem:[#allocation4 + $0x3e4] ss:$16 sps:$4 sm:$0xff]   ;;  %v2022_v35 = vld [vmem:[#allocation4 + $0x3e0] ss:$16 sps:$4 sm:$0xff]   ;;  %v2082_v17 = vld [vmem:[#allocation4 + $0x2ac] ss:$16 sps:$4 sm:$0xff]  }
  0x51   :  { %898 = vmatpush1.bf16.msra.mxu0 %v1997_v18  ;;  %v2023_v36 = vld [vmem:[#allocation4 + $0x1c4] ss:$16 sps:$4 sm:$0xff]   ;;  %v2027_v38 = vld [vmem:[#allocation4 + $0x1c0] ss:$16 sps:$4 sm:$0xff]   ;;  %v2077_v18 = vld [vmem:[#allocation4 + $0xa8] ss:$16 sps:$4 sm:$0xff]  }
  0x52   :  { %939 = vmatpush1.bf16.msra.mxu1 %v1998_v19  ;;  %899 = vmatprep.subr.bf16.mxu0 %v1999_v20  ;;  %v2025_v37 = vld [vmem:[#allocation4 + $0x3c4] ss:$16 sps:$4 sm:$0xff]   ;;  %v2028_v39 = vld [vmem:[#allocation4 + $0x3c0] ss:$16 sps:$4 sm:$0xff]   ;;  %v2080_v19 = vld [vmem:[#allocation4 + $0x2a8] ss:$16 sps:$4 sm:$0xff]  }
  0x53   :  { %940 = vmatprep.subr.bf16.mxu1 %v2001_v21  ;;  %v2029_v40 = vld [vmem:[#allocation4 + $0x1a4] ss:$16 sps:$4 sm:$0xff]   ;;  %v2033_v42 = vld [vmem:[#allocation4 + $0x1a0] ss:$16 sps:$4 sm:$0xff]   ;;  %v2085_v20 = vld [vmem:[#allocation4 + $0x8c] ss:$16 sps:$4 sm:$0xff]  }
  0x54   :  { %v2031_v41 = vld [vmem:[#allocation4 + $0x3a4] ss:$16 sps:$4 sm:$0xff]   ;;  %v2034_v43 = vld [vmem:[#allocation4 + $0x3a0] ss:$16 sps:$4 sm:$0xff]   ;;  %v2088_v21 = vld [vmem:[#allocation4 + $0x28c] ss:$16 sps:$4 sm:$0xff]  }
  0x55   :  { %900 = vmatpush1.bf16.msra.mxu0 %v2003_v22  ;;  %v2035_v44 = vld [vmem:[#allocation4 + $0x184] ss:$16 sps:$4 sm:$0xff]   ;;  %v2039_v47 = vld [vmem:[#allocation4 + $0x180] ss:$16 sps:$4 sm:$0xff]   ;;  %v2083_v22 = vld [vmem:[#allocation4 + $0x88] ss:$16 sps:$4 sm:$0xff]  }
  0x56   :  { %941 = vmatpush1.bf16.msra.mxu1 %v2004_v23  ;;  %901 = vmatprep.subr.bf16.mxu0 %v2005_v24  ;;  %v2037_v45 = vld [vmem:[#allocation4 + $0x384] ss:$16 sps:$4 sm:$0xff]   ;;  %v2040_v48 = vld [vmem:[#allocation4 + $0x380] ss:$16 sps:$4 sm:$0xff]   ;;  %v2086_v23 = vld [vmem:[#allocation4 + $0x288] ss:$16 sps:$4 sm:$0xff]  }
  0x57   :  { %942 = vmatprep.subr.bf16.mxu1 %v2007_v25  ;;  %v2041_v51 = vld [vmem:[#allocation4 + $0x164] ss:$16 sps:$4 sm:$0xff]   ;;  %v2045_v54 = vld [vmem:[#allocation4 + $0x160] ss:$16 sps:$4 sm:$0xff]   ;;  %v2091_v24 = vld [vmem:[#allocation4 + $0x6c] ss:$16 sps:$4 sm:$0xff]  }
  0x58   :  { %v2043_v53 = vld [vmem:[#allocation4 + $0x364] ss:$16 sps:$4 sm:$0xff]   ;;  %v2046_v55 = vld [vmem:[#allocation4 + $0x360] ss:$16 sps:$4 sm:$0xff]   ;;  %v2094_v25 = vld [vmem:[#allocation4 + $0x26c] ss:$16 sps:$4 sm:$0xff]  }
  0x59   :  { %902 = vmatpush1.bf16.msra.mxu0 %v2009_v26  ;;  %v2047_v56 = vld [vmem:[#allocation4 + $0x144] ss:$16 sps:$4 sm:$0xff]   ;;  %v2051_v58 = vld [vmem:[#allocation4 + $0x140] ss:$16 sps:$4 sm:$0xff]   ;;  %v2089_v26 = vld [vmem:[#allocation4 + $0x68] ss:$16 sps:$4 sm:$0xff]  }
  0x5a   :  { %943 = vmatpush1.bf16.msra.mxu1 %v2010_v27  ;;  %903 = vmatprep.subr.bf16.mxu0 %v2011_v28  ;;  %v2049_v57 = vld [vmem:[#allocation4 + $0x344] ss:$16 sps:$4 sm:$0xff]   ;;  %v2052_v59 = vld [vmem:[#allocation4 + $0x340] ss:$16 sps:$4 sm:$0xff]   ;;  %v2092_v27 = vld [vmem:[#allocation4 + $0x268] ss:$16 sps:$4 sm:$0xff]  }
  0x5b   :  { %944 = vmatprep.subr.bf16.mxu1 %v2013_v29  ;;  %v2053_v60 = vld [vmem:[#allocation4 + $0x124] ss:$16 sps:$4 sm:$0xff]   ;;  %v2057_v62 = vld [vmem:[#allocation4 + $0x120] ss:$16 sps:$4 sm:$0xff]   ;;  %v2097_v28 = vld [vmem:[#allocation4 + $0x4c] ss:$16 sps:$4 sm:$0xff]  }
  0x5c   :  { %v2055_v61 = vld [vmem:[#allocation4 + $0x324] ss:$16 sps:$4 sm:$0xff]   ;;  %v2058_v63 = vld [vmem:[#allocation4 + $0x320] ss:$16 sps:$4 sm:$0xff]   ;;  %v2100_v29 = vld [vmem:[#allocation4 + $0x24c] ss:$16 sps:$4 sm:$0xff]  }
  0x5d   :  { %904 = vmatpush1.bf16.msra.mxu0 %v2015_v30  ;;  %v2059_v0 = vld [vmem:[#allocation4 + $0x104] ss:$16 sps:$4 sm:$0xff]   ;;  %v2063_v2 = vld [vmem:[#allocation4 + $0x100] ss:$16 sps:$4 sm:$0xff]   ;;  %v2095_v30 = vld [vmem:[#allocation4 + $0x48] ss:$16 sps:$4 sm:$0xff]  }
  0x5e   :  { %945 = vmatpush1.bf16.msra.mxu1 %v2016_v31  ;;  %905 = vmatprep.subr.bf16.mxu0 %v2017_v32  ;;  %v2061_v1 = vld [vmem:[#allocation4 + $0x304] ss:$16 sps:$4 sm:$0xff]   ;;  %v2064_v3 = vld [vmem:[#allocation4 + $0x300] ss:$16 sps:$4 sm:$0xff]   ;;  %v2098_v31 = vld [vmem:[#allocation4 + $0x248] ss:$16 sps:$4 sm:$0xff]  }
  0x5f   :  { %946 = vmatprep.subr.bf16.mxu1 %v2019_v33  ;;  %v91_v4 = vld [vmem:[#allocation2] sm:$0xff]  ;;  %v93_v5 = vld [vmem:[#allocation2 + $0x10] sm:$0xff]  ;;  %v2103_v32 = vld [vmem:[#allocation4 + $0x2c] ss:$16 sps:$4 sm:$0xff]  }
  0x60   :  { %v2448_v8 = vpack.c.bf16 %v91_v4, %v91_v4  ;;  %v2450_v9 = vpack.c.bf16 %v93_v5, %v93_v5  ;;  %v2106_v33 = vld [vmem:[#allocation4 + $0x22c] ss:$16 sps:$4 sm:$0xff]  }
  0x61   :  { %906 = vmatpush2.bf16.msra.mxu0 %v2021_v34  ;;  %v2101_v34 = vld [vmem:[#allocation4 + $0x28] ss:$16 sps:$4 sm:$0xff]   ;;  %v2157_v4 = vld [vmem:[#allocation4 + $0x10c] ss:$16 sps:$4 sm:$0xff]  }
  0x62   :  { %947 = vmatpush2.bf16.msra.mxu1 %v2022_v35  ;;  %907 = vmatprep.subr.bf16.mxu0 %v2023_v36  ;;  %v2104_v35 = vld [vmem:[#allocation4 + $0x228] ss:$16 sps:$4 sm:$0xff]   ;;  %v2109_v36 = vld [vmem:[#allocation4 + $0xc] ss:$16 sps:$4 sm:$0xff]  }
  0x63   :  { %948 = vmatprep.subr.bf16.mxu1 %v2025_v37  ;;  %v2112_v37 = vld [vmem:[#allocation4 + $0x20c] ss:$16 sps:$4 sm:$0xff]  }
  0x64   :  { %v2160_v5 = vld [vmem:[#allocation4 + $0x30c] ss:$16 sps:$4 sm:$0xff]  }
  0x65   :  { %908 = vmatpush2.bf16.msra.mxu0 %v2027_v38  ;;  %v2107_v38 = vld [vmem:[#allocation4 + $0x8] ss:$16 sps:$4 sm:$0xff]  }
  0x66   :  { %949 = vmatpush2.bf16.msra.mxu1 %v2028_v39  ;;  %909 = vmatprep.subr.bf16.mxu0 %v2029_v40  ;;  %v2110_v39 = vld [vmem:[#allocation4 + $0x208] ss:$16 sps:$4 sm:$0xff]   ;;  %v2115_v40 = vld [vmem:[#allocation4 + $0x1ec] ss:$16 sps:$4 sm:$0xff]  }
  0x67   :  { %950 = vmatprep.subr.bf16.mxu1 %v2031_v41  ;;  %v2118_v41 = vld [vmem:[#allocation4 + $0x3ec] ss:$16 sps:$4 sm:$0xff]  }
  0x69   :  { %910 = vmatpush2.bf16.msra.mxu0 %v2033_v42  ;;  %v2113_v42 = vld [vmem:[#allocation4 + $0x1e8] ss:$16 sps:$4 sm:$0xff]  }
  0x6a   :  { %951 = vmatpush2.bf16.msra.mxu1 %v2034_v43  ;;  %911 = vmatprep.subr.bf16.mxu0 %v2035_v44  ;;  %v2116_v43 = vld [vmem:[#allocation4 + $0x3e8] ss:$16 sps:$4 sm:$0xff]   ;;  %v2121_v44 = vld [vmem:[#allocation4 + $0x1cc] ss:$16 sps:$4 sm:$0xff]  }
  0x6b   :  { %952 = vmatprep.subr.bf16.mxu1 %v2037_v45  ;;  %v2124_v45 = vld [vmem:[#allocation4 + $0x3cc] ss:$16 sps:$4 sm:$0xff]  }
  0x6d   :  { %912 = vmatpush2.bf16.msra.mxu0 %v2039_v47  ;;  %v2122_v47 = vld [vmem:[#allocation4 + $0x3c8] ss:$16 sps:$4 sm:$0xff]  }
  0x6e   :  { %953 = vmatpush2.bf16.msra.mxu1 %v2040_v48  ;;  %913 = vmatprep.subr.bf16.mxu0 %v2041_v51  ;;  %v2127_v48 = vld [vmem:[#allocation4 + $0x1ac] ss:$16 sps:$4 sm:$0xff]   ;;  %v2128_v51 = vld [vmem:[#allocation4 + $0x3a8] ss:$16 sps:$4 sm:$0xff]  }
  0x6f   :  { %954 = vmatprep.subr.bf16.mxu1 %v2043_v53  ;;  %v2136_v53 = vld [vmem:[#allocation4 + $0x38c] ss:$16 sps:$4 sm:$0xff]  }
  0x71   :  { %914 = vmatpush2.bf16.msra.mxu0 %v2045_v54  ;;  %v2131_v54 = vld [vmem:[#allocation4 + $0x188] ss:$16 sps:$4 sm:$0xff]  }
  0x72   :  { %955 = vmatpush2.bf16.msra.mxu1 %v2046_v55  ;;  %915 = vmatprep.subr.bf16.mxu0 %v2047_v56  ;;  %v2134_v55 = vld [vmem:[#allocation4 + $0x388] ss:$16 sps:$4 sm:$0xff]   ;;  %v2139_v56 = vld [vmem:[#allocation4 + $0x16c] ss:$16 sps:$4 sm:$0xff]  }
  0x73   :  { %956 = vmatprep.subr.bf16.mxu1 %v2049_v57  ;;  %v2142_v57 = vld [vmem:[#allocation4 + $0x36c] ss:$16 sps:$4 sm:$0xff]  }
  0x75   :  { %916 = vmatpush2.bf16.msra.mxu0 %v2051_v58  ;;  %v2137_v58 = vld [vmem:[#allocation4 + $0x168] ss:$16 sps:$4 sm:$0xff]  }
  0x76   :  { %957 = vmatpush2.bf16.msra.mxu1 %v2052_v59  ;;  %917 = vmatprep.subr.bf16.mxu0 %v2053_v60  ;;  %v2140_v59 = vld [vmem:[#allocation4 + $0x368] ss:$16 sps:$4 sm:$0xff]   ;;  %v2145_v60 = vld [vmem:[#allocation4 + $0x14c] ss:$16 sps:$4 sm:$0xff]  }
  0x77   :  { %958 = vmatprep.subr.bf16.mxu1 %v2055_v61  ;;  %v2148_v61 = vld [vmem:[#allocation4 + $0x34c] ss:$16 sps:$4 sm:$0xff]  }
  0x79   :  { %918 = vmatpush2.bf16.msra.mxu0 %v2057_v62  ;;  %v2143_v62 = vld [vmem:[#allocation4 + $0x148] ss:$16 sps:$4 sm:$0xff]  }
  0x7a   :  { %959 = vmatpush2.bf16.msra.mxu1 %v2058_v63  ;;  %919 = vmatprep.subr.bf16.mxu0 %v2059_v0  ;;  %v2146_v63 = vld [vmem:[#allocation4 + $0x348] ss:$16 sps:$4 sm:$0xff]   ;;  %v2151_v0 = vld [vmem:[#allocation4 + $0x12c] ss:$16 sps:$4 sm:$0xff]  }
  0x7b   :  { %960 = vmatprep.subr.bf16.mxu1 %v2061_v1  ;;  %v2154_v1 = vld [vmem:[#allocation4 + $0x32c] ss:$16 sps:$4 sm:$0xff]  }
  0x7d   :  { %920 = vmatpush2.bf16.msra.mxu0 %v2063_v2  ;;  %v2149_v2 = vld [vmem:[#allocation4 + $0x128] ss:$16 sps:$4 sm:$0xff]  }
  0x7e   :  { %961 = vmatpush2.bf16.msra.mxu1 %v2064_v3  ;;  %971 = vmatprep.subr.bf16.mxu0 %v2067_v6  ;;  %v2152_v3 = vld [vmem:[#allocation4 + $0x328] ss:$16 sps:$4 sm:$0xff]  }
  0x7f   :  { %1012 = vmatprep.subr.bf16.mxu1 %v2070_v7  ;;  %v2155_v6 = vld [vmem:[#allocation4 + $0x108] ss:$16 sps:$4 sm:$0xff]  }
  0x80   :  { %922 = vmatmul.mubr.bf16.vlgmr.msra.gmra.mxu0 %v2448_v8  ;;  %v2158_v7 = vld [vmem:[#allocation4 + $0x308] ss:$16 sps:$4 sm:$0xff]  }
  0x81   :  { %963 = vmatmul.mubr.bf16.vlgmr.msra.gmra.mxu1 %v2450_v9  ;;  %972 = vmatpush1.bf16.msra.mxu0 %v2065_v10  ;;  %v2163_v10 = vld [vmem:[#allocation7 + $0x74] ss:$8 sps:$4 sm:$0xff]  }
  0x82   :  { %1013 = vmatpush1.bf16.msra.mxu1 %v2068_v11  ;;  %973 = vmatprep.subr.bf16.mxu0 %v2073_v12  ;;  %v2161_v11 = vld [vmem:[#allocation7 + $0x70] ss:$8 sps:$4 sm:$0xff]   ;;  %v2166_v12 = vld [vmem:[#allocation7 + $0x64] ss:$8 sps:$4 sm:$0xff]  }
  0x83   :  { %1014 = vmatprep.subr.bf16.mxu1 %v2076_v13  ;;  %1003 = vmatprep.mubr.bf16.mxu0 %v2445_v49  ;;  %v2130_v49 = vld [vmem:[#allocation4 + $0x3ac] ss:$16 sps:$4 sm:$0xff]  }
  0x84   :  { %1044 = vmatprep.mubr.bf16.mxu1 %v98_v52  ;;  %v2133_v52 = vld [vmem:[#allocation4 + $0x18c] ss:$16 sps:$4 sm:$0xff]  }
  0x85   :  { %974 = vmatpush1.bf16.msra.mxu0 %v2071_v14  ;;  %v2164_v13 = vld [vmem:[#allocation7 + $0x60] ss:$8 sps:$4 sm:$0xff]   ;;  %v2169_v14 = vld [vmem:[#allocation7 + $0x54] ss:$8 sps:$4 sm:$0xff]  }
  0x86   :  { %1015 = vmatpush1.bf16.msra.mxu1 %v2074_v15  ;;  %975 = vmatprep.subr.bf16.mxu0 %v2079_v16  ;;  %v2167_v15 = vld [vmem:[#allocation7 + $0x50] ss:$8 sps:$4 sm:$0xff]   ;;  %v2172_v16 = vld [vmem:[#allocation7 + $0x44] ss:$8 sps:$4 sm:$0xff]  }
  0x87   :  { %1016 = vmatprep.subr.bf16.mxu1 %v2082_v17  ;;  %v2170_v17 = vld [vmem:[#allocation7 + $0x40] ss:$8 sps:$4 sm:$0xff]  }
  0x89   :  { %976 = vmatpush1.bf16.msra.mxu0 %v2077_v18  ;;  %v2175_v18 = vld [vmem:[#allocation7 + $0x34] ss:$8 sps:$4 sm:$0xff]  }
  0x8a   :  { %1017 = vmatpush1.bf16.msra.mxu1 %v2080_v19  ;;  %977 = vmatprep.subr.bf16.mxu0 %v2085_v20  ;;  %v2211_v19 = vld [vmem:[#allocation7 + $0x174] ss:$8 sps:$4 sm:$0xff]   ;;  %v2209_v20 = vld [vmem:[#allocation7 + $0x170] ss:$8 sps:$4 sm:$0xff]  }
  0x8b   :  { %1018 = vmatprep.subr.bf16.mxu1 %v2088_v21  ;;  %v2214_v21 = vld [vmem:[#allocation7 + $0x164] ss:$8 sps:$4 sm:$0xff]  }
  0x8d   :  { %978 = vmatpush1.bf16.msra.mxu0 %v2083_v22  ;;  %v2178_v22 = vld [vmem:[#allocation7 + $0x24] ss:$8 sps:$4 sm:$0xff]  }
  0x8e   :  { %1019 = vmatpush1.bf16.msra.mxu1 %v2086_v23  ;;  %979 = vmatprep.subr.bf16.mxu0 %v2091_v24  ;;  %v2217_v23 = vld [vmem:[#allocation7 + $0x154] ss:$8 sps:$4 sm:$0xff]   ;;  %v2176_v24 = vld [vmem:[#allocation7 + $0x20] ss:$8 sps:$4 sm:$0xff]  }
  0x8f   :  { %1020 = vmatprep.subr.bf16.mxu1 %v2094_v25  ;;  %v2215_v25 = vld [vmem:[#allocation7 + $0x150] ss:$8 sps:$4 sm:$0xff]  }
  0x91   :  { %980 = vmatpush1.bf16.msra.mxu0 %v2089_v26  ;;  %v2181_v26 = vld [vmem:[#allocation7 + $0x14] ss:$8 sps:$4 sm:$0xff]  }
  0x92   :  { %1021 = vmatpush1.bf16.msra.mxu1 %v2092_v27  ;;  %981 = vmatprep.subr.bf16.mxu0 %v2097_v28  ;;  %v2220_v27 = vld [vmem:[#allocation7 + $0x144] ss:$8 sps:$4 sm:$0xff]   ;;  %v2179_v28 = vld [vmem:[#allocation7 + $0x10] ss:$8 sps:$4 sm:$0xff]  }
  0x93   :  { %1022 = vmatprep.subr.bf16.mxu1 %v2100_v29  ;;  %v2218_v29 = vld [vmem:[#allocation7 + $0x140] ss:$8 sps:$4 sm:$0xff]  }
  0x95   :  { %982 = vmatpush1.bf16.msra.mxu0 %v2095_v30  ;;  %v2184_v30 = vld [vmem:[#allocation7 + $0x4] ss:$8 sps:$4 sm:$0xff]  }
  0x96   :  { %1023 = vmatpush1.bf16.msra.mxu1 %v2098_v31  ;;  %983 = vmatprep.subr.bf16.mxu0 %v2103_v32  ;;  %v2223_v31 = vld [vmem:[#allocation7 + $0x134] ss:$8 sps:$4 sm:$0xff]   ;;  %v2182_v32 = vld [vmem:[#allocation7] ss:$8 sps:$4 sm:$0xff]  }
  0x97   :  { %1024 = vmatprep.subr.bf16.mxu1 %v2106_v33  ;;  %v2221_v33 = vld [vmem:[#allocation7 + $0x130] ss:$8 sps:$4 sm:$0xff]  }
  0x99   :  { %984 = vmatpush1.bf16.msra.mxu0 %v2101_v34  ;;  %v2187_v34 = vld [vmem:[#allocation7 + $0xf4] ss:$8 sps:$4 sm:$0xff]  }
  0x9a   :  { %1025 = vmatpush1.bf16.msra.mxu1 %v2104_v35  ;;  %985 = vmatprep.subr.bf16.mxu0 %v2109_v36  ;;  %v2226_v35 = vld [vmem:[#allocation7 + $0x124] ss:$8 sps:$4 sm:$0xff]   ;;  %v2185_v36 = vld [vmem:[#allocation7 + $0xf0] ss:$8 sps:$4 sm:$0xff]  }
  0x9b   :  { %1026 = vmatprep.subr.bf16.mxu1 %v2112_v37  ;;  %v2224_v37 = vld [vmem:[#allocation7 + $0x120] ss:$8 sps:$4 sm:$0xff]  }
  0x9d   :  { %986 = vmatpush1.bf16.msra.mxu0 %v2107_v38  ;;  %v2190_v38 = vld [vmem:[#allocation7 + $0xe4] ss:$8 sps:$4 sm:$0xff]  }
  0x9e   :  { %1027 = vmatpush1.bf16.msra.mxu1 %v2110_v39  ;;  %987 = vmatprep.subr.bf16.mxu0 %v2115_v40  ;;  %v2229_v39 = vld [vmem:[#allocation7 + $0x114] ss:$8 sps:$4 sm:$0xff]   ;;  %v2188_v40 = vld [vmem:[#allocation7 + $0xe0] ss:$8 sps:$4 sm:$0xff]  }
  0x9f   :  { %1028 = vmatprep.subr.bf16.mxu1 %v2118_v41  ;;  %v2227_v41 = vld [vmem:[#allocation7 + $0x110] ss:$8 sps:$4 sm:$0xff]  }
  0xa1   :  { %988 = vmatpush2.bf16.msra.mxu0 %v2113_v42  ;;  %v2193_v42 = vld [vmem:[#allocation7 + $0xd4] ss:$8 sps:$4 sm:$0xff]  }
  0xa2   :  { %1029 = vmatpush2.bf16.msra.mxu1 %v2116_v43  ;;  %989 = vmatprep.subr.bf16.mxu0 %v2121_v44  ;;  %v2232_v43 = vld [vmem:[#allocation7 + $0x104] ss:$8 sps:$4 sm:$0xff]   ;;  %v2191_v44 = vld [vmem:[#allocation7 + $0xd0] ss:$8 sps:$4 sm:$0xff]  }
  0xa3   :  { %1030 = vmatprep.subr.bf16.mxu1 %v2124_v45  ;;  %v2230_v45 = vld [vmem:[#allocation7 + $0x100] ss:$8 sps:$4 sm:$0xff]  }
  0xa5   :  { %990 = vmatpush2.bf16.msra.mxu0 %v2119_v46  ;;  %v2196_v46 = vld [vmem:[#allocation7 + $0xc4] ss:$8 sps:$4 sm:$0xff]  }
  0xa6   :  { %1031 = vmatpush2.bf16.msra.mxu1 %v2122_v47  ;;  %991 = vmatprep.subr.bf16.mxu0 %v2127_v48  ;;  %v2235_v47 = vld [vmem:[#allocation7 + $0x1f4] ss:$8 sps:$4 sm:$0xff]   ;;  %v2194_v48 = vld [vmem:[#allocation7 + $0xc0] ss:$8 sps:$4 sm:$0xff]  }
  0xa7   :  { %1032 = vmatprep.subr.bf16.mxu1 %v2130_v49  ;;  %v2233_v49 = vld [vmem:[#allocation7 + $0x1f0] ss:$8 sps:$4 sm:$0xff]  }
  0xa9   :  { %992 = vmatpush2.bf16.msra.mxu0 %v2125_v50  ;;  %v2199_v50 = vld [vmem:[#allocation7 + $0xb4] ss:$8 sps:$4 sm:$0xff]  }
  0xaa   :  { %1033 = vmatpush2.bf16.msra.mxu1 %v2128_v51  ;;  %993 = vmatprep.subr.bf16.mxu0 %v2133_v52  ;;  %v2238_v51 = vld [vmem:[#allocation7 + $0x1e4] ss:$8 sps:$4 sm:$0xff]   ;;  %v2197_v52 = vld [vmem:[#allocation7 + $0xb0] ss:$8 sps:$4 sm:$0xff]  }
  0xab   :  { %1034 = vmatprep.subr.bf16.mxu1 %v2136_v53  ;;  %v2236_v53 = vld [vmem:[#allocation7 + $0x1e0] ss:$8 sps:$4 sm:$0xff]  }
  0xad   :  { %994 = vmatpush2.bf16.msra.mxu0 %v2131_v54  ;;  %v2202_v54 = vld [vmem:[#allocation7 + $0xa4] ss:$8 sps:$4 sm:$0xff]  }
  0xae   :  { %1035 = vmatpush2.bf16.msra.mxu1 %v2134_v55  ;;  %995 = vmatprep.subr.bf16.mxu0 %v2139_v56  ;;  %v2241_v55 = vld [vmem:[#allocation7 + $0x1d4] ss:$8 sps:$4 sm:$0xff]   ;;  %v2200_v56 = vld [vmem:[#allocation7 + $0xa0] ss:$8 sps:$4 sm:$0xff]  }
  0xaf   :  { %1036 = vmatprep.subr.bf16.mxu1 %v2142_v57  ;;  %v2239_v57 = vld [vmem:[#allocation7 + $0x1d0] ss:$8 sps:$4 sm:$0xff]  }
  0xb1   :  { %996 = vmatpush2.bf16.msra.mxu0 %v2137_v58  ;;  %v2205_v58 = vld [vmem:[#allocation7 + $0x94] ss:$8 sps:$4 sm:$0xff]  }
  0xb2   :  { %1037 = vmatpush2.bf16.msra.mxu1 %v2140_v59  ;;  %997 = vmatprep.subr.bf16.mxu0 %v2145_v60  ;;  %v2244_v59 = vld [vmem:[#allocation7 + $0x1c4] ss:$8 sps:$4 sm:$0xff]   ;;  %v2203_v60 = vld [vmem:[#allocation7 + $0x90] ss:$8 sps:$4 sm:$0xff]  }
  0xb3   :  { %1038 = vmatprep.subr.bf16.mxu1 %v2148_v61  ;;  %v2242_v61 = vld [vmem:[#allocation7 + $0x1c0] ss:$8 sps:$4 sm:$0xff]  }
  0xb5   :  { %998 = vmatpush2.bf16.msra.mxu0 %v2143_v62  ;;  %v2208_v62 = vld [vmem:[#allocation7 + $0x84] ss:$8 sps:$4 sm:$0xff]  }
  0xb6   :  { %1039 = vmatpush2.bf16.msra.mxu1 %v2146_v63  ;;  %999 = vmatprep.subr.bf16.mxu0 %v2151_v0  ;;  %v2247_v63 = vld [vmem:[#allocation7 + $0x1b4] ss:$8 sps:$4 sm:$0xff]   ;;  %v2206_v0 = vld [vmem:[#allocation7 + $0x80] ss:$8 sps:$4 sm:$0xff]  }
  0xb7   :  { %1040 = vmatprep.subr.bf16.mxu1 %v2154_v1  ;;  %v2245_v1 = vld [vmem:[#allocation7 + $0x1b0] ss:$8 sps:$4 sm:$0xff]  }
  0xb9   :  { %1000 = vmatpush2.bf16.msra.mxu0 %v2149_v2  ;;  %v2250_v2 = vld [vmem:[#allocation7 + $0x1a4] ss:$8 sps:$4 sm:$0xff]  }
  0xba   :  { %1041 = vmatpush2.bf16.msra.mxu1 %v2152_v3  ;;  %1001 = vmatprep.subr.bf16.mxu0 %v2157_v4  ;;  %v2248_v3 = vld [vmem:[#allocation7 + $0x1a0] ss:$8 sps:$4 sm:$0xff]   ;;  %v2253_v4 = vld [vmem:[#allocation7 + $0x194] ss:$8 sps:$4 sm:$0xff]  }
  0xbb   :  { %1042 = vmatprep.subr.bf16.mxu1 %v2160_v5  ;;  %v2251_v5 = vld [vmem:[#allocation7 + $0x190] ss:$8 sps:$4 sm:$0xff]  }
  0xbd   :  { %1002 = vmatpush2.bf16.msra.mxu0 %v2155_v6  ;;  %v2256_v6 = vld [vmem:[#allocation7 + $0x184] ss:$8 sps:$4 sm:$0xff]  }
  0xbe   :  { %1043 = vmatpush2.bf16.msra.mxu1 %v2158_v7  ;;  %1457 = vmatprep.subr.bf16.mxu0 %v2163_v10  ;;  %v2254_v7 = vld [vmem:[#allocation7 + $0x180] ss:$8 sps:$4 sm:$0xff]   ;;  %v229_v10 = vlaneseq }
  0xbf   :  { %1498 = vmatprep.subr.bf16.mxu1 %v2211_v19 }
  0xc0   :  { %1004 = vmatmul.mubr.bf16.vlgmr.msra.gmra.mxu0 %v2448_v8  ;;  %v2173_v8 = vld [vmem:[#allocation7 + $0x30] ss:$8 sps:$4 sm:$0xff]  }
  0xc1   :  { %1045 = vmatmul.mubr.bf16.vlgmr.msra.gmra.mxu1 %v2450_v9  ;;  %1458 = vmatpush1.bf16.msra.mxu0 %v2161_v11  ;;  %v2212_v9 = vld [vmem:[#allocation7 + $0x160] ss:$8 sps:$4 sm:$0xff]   ;;  %v2457_v11 = vshrl.u32 %v229_v10, 7 }
  0xc2   :  { %1459 = vmatprep.subr.bf16.mxu0 %v2166_v12  ;;  %1499 = vmatpush1.bf16.msra.mxu1 %v2209_v20 }
  0xc3   :  { %1500 = vmatprep.subr.bf16.mxu1 %v2214_v21  ;;  %v231_v12 = vsub.s32 0, %v2457_v11 }
  0xc5   :  { %1460 = vmatpush1.bf16.msra.mxu0 %v2164_v13  ;;  %v227_v13 = vld [vmem:[#allocation6] sm:$0xf] }
  0xc6   :  { %1461 = vmatprep.subr.bf16.mxu0 %v2169_v14  ;;  %1501 = vmatpush1.bf16.msra.mxu1 %v2212_v9  ;;  %v235_v14 = vsub.s32 1, %v2457_v11 }
  0xc7   :  { %1502 = vmatprep.subr.bf16.mxu1 %v2217_v23 }
  0xc9   :  { %1462 = vmatpush1.bf16.msra.mxu0 %v2167_v15  ;;  %v232_v15 = vrot.slane %v227_v13, %v231_v12 }
  0xca   :  { %1463 = vmatprep.subr.bf16.mxu0 %v2172_v16  ;;  %1503 = vmatpush1.bf16.msra.mxu1 %v2215_v25  ;;  %v236_v16 = vrot.slane %v227_v13, %v235_v14 }
  0xcb   :  { %1504 = vmatprep.subr.bf16.mxu1 %v2220_v27 }
  0xcd   :  { %1464 = vmatpush1.bf16.msra.mxu0 %v2170_v17 }
  0xce   :  { %1465 = vmatprep.subr.bf16.mxu0 %v2175_v18  ;;  %1505 = vmatpush1.bf16.msra.mxu1 %v2218_v29 }
  0xcf   :  { %1506 = vmatprep.subr.bf16.mxu1 %v2223_v31  ;;  %v239_v31 = vsub.s32 2, %v2457_v11 }
  0xd1   :  { %1466 = vmatpush1.bf16.msra.mxu0 %v2173_v8 }
  0xd2   :  { %1467 = vmatprep.subr.bf16.mxu0 %v2178_v22  ;;  %1507 = vmatpush1.bf16.msra.mxu1 %v2221_v33  ;;  %v240_v33 = vrot.slane %v227_v13, %v239_v31 }
  0xd3   :  { %1508 = vmatprep.subr.bf16.mxu1 %v2226_v35 }
  0xd5   :  { %1468 = vmatpush1.bf16.msra.mxu0 %v2176_v24 }
  0xd6   :  { %1469 = vmatprep.subr.bf16.mxu0 %v2181_v26  ;;  %1509 = vmatpush1.bf16.msra.mxu1 %v2224_v37 }
  0xd7   :  { %1510 = vmatprep.subr.bf16.mxu1 %v2229_v39 }
  0xd9   :  { %1470 = vmatpush1.bf16.msra.mxu0 %v2179_v28 }
  0xda   :  { %1471 = vmatprep.subr.bf16.mxu0 %v2184_v30  ;;  %1511 = vmatpush1.bf16.msra.mxu1 %v2227_v41 }
  0xdb   :  { %1512 = vmatprep.subr.bf16.mxu1 %v2232_v43 }
  0xdd   :  { %1472 = vmatpush1.bf16.msra.mxu0 %v2182_v32  ;;  %v243_v32 = vsub.s32 3, %v2457_v11  ;;  %v1919_v11 = vld [vmem:[%s2486_s6] ss:$0 sm:$0xff] }
  0xde   :  { %1473 = vmatprep.subr.bf16.mxu0 %v2187_v34  ;;  %1513 = vmatpush1.bf16.msra.mxu1 %v2230_v45 }
  0xdf   :  { %1514 = vmatprep.subr.bf16.mxu1 %v2235_v47  ;;  %v244_v34 = vrot.slane %v227_v13, %v243_v32 }
  0xe1   :  { %1474 = vmatpush2.bf16.msra.mxu0 %v2185_v36 }
  0xe2   :  { %1475 = vmatprep.subr.bf16.mxu0 %v2190_v38  ;;  %1515 = vmatpush2.bf16.msra.mxu1 %v2233_v49 }
  0xe3   :  { %1516 = vmatprep.subr.bf16.mxu1 %v2238_v51  ;;  %v2257_v51 = vld [vmem:[#allocation9 + $0x78] sm:$0xff]  }
  0xe5   :  { %1476 = vmatpush2.bf16.msra.mxu0 %v2188_v40 }
  0xe6   :  { %1477 = vmatprep.subr.bf16.mxu0 %v2193_v42  ;;  %1517 = vmatpush2.bf16.msra.mxu1 %v2236_v53  ;;  %v2259_v53 = vld [vmem:[#allocation9 + $0x70] sm:$0xff]  }
  0xe7   :  { %1518 = vmatprep.subr.bf16.mxu1 %v2241_v55  ;;  %v2261_v55 = vld [vmem:[#allocation9 + $0x68] sm:$0xff]  }
  0xe9   :  { %1478 = vmatpush2.bf16.msra.mxu0 %v2191_v44 }
  0xea   :  { %1479 = vmatprep.subr.bf16.mxu0 %v2196_v46  ;;  %1519 = vmatpush2.bf16.msra.mxu1 %v2239_v57  ;;  %v2263_v57 = vld [vmem:[#allocation9 + $0x60] sm:$0xff]  }
  0xeb   :  { %1520 = vmatprep.subr.bf16.mxu1 %v2244_v59  ;;  %v2265_v59 = vld [vmem:[#allocation9 + $0x58] sm:$0xff]  }
  0xed   :  { %1480 = vmatpush2.bf16.msra.mxu0 %v2194_v48 }
  0xee   :  { %1481 = vmatprep.subr.bf16.mxu0 %v2199_v50  ;;  %1521 = vmatpush2.bf16.msra.mxu1 %v2242_v61  ;;  %v2267_v61 = vld [vmem:[#allocation9 + $0x50] sm:$0xff]  }
  0xef   :  { %1522 = vmatprep.subr.bf16.mxu1 %v2247_v63  ;;  %v2269_v63 = vld [vmem:[#allocation9 + $0x48] sm:$0xff]  }
  0xf1   :  { %1482 = vmatpush2.bf16.msra.mxu0 %v2197_v52  ;;  %v2258_v52 = vld [vmem:[#allocation9 + $0x38] sm:$0xff]  }
  0xf2   :  { %1483 = vmatprep.subr.bf16.mxu0 %v2202_v54  ;;  %1523 = vmatpush2.bf16.msra.mxu1 %v2245_v1  ;;  %v2260_v54 = vld [vmem:[#allocation9 + $0x30] sm:$0xff]   ;;  %v2271_v1 = vld [vmem:[#allocation9 + $0x40] sm:$0xff]  }
  0xf3   :  { %1524 = vmatprep.subr.bf16.mxu1 %v2250_v2  ;;  %v2272_v2 = vld [vmem:[#allocation9] sm:$0xff]  }
  0xf5   :  { %1484 = vmatpush2.bf16.msra.mxu0 %v2200_v56  ;;  %v2262_v56 = vld [vmem:[#allocation9 + $0x28] sm:$0xff]  }
  0xf6   :  { %1485 = vmatprep.subr.bf16.mxu0 %v2205_v58  ;;  %1525 = vmatpush2.bf16.msra.mxu1 %v2248_v3  ;;  %v2264_v58 = vld [vmem:[#allocation9 + $0x20] sm:$0xff]  }
  0xf7   :  { %1526 = vmatprep.subr.bf16.mxu1 %v2253_v4 }
  0xf9   :  { %1486 = vmatpush2.bf16.msra.mxu0 %v2203_v60  ;;  %v2266_v60 = vld [vmem:[#allocation9 + $0x18] sm:$0xff]  }
  0xfa   :  { %1487 = vmatprep.subr.bf16.mxu0 %v2208_v62  ;;  %1527 = vmatpush2.bf16.msra.mxu1 %v2251_v5  ;;  %v2268_v62 = vld [vmem:[#allocation9 + $0x10] sm:$0xff]  }
  0xfb   :  { %1528 = vmatprep.subr.bf16.mxu1 %v2256_v6 }
  0xfd   :  { %1488 = vmatpush2.bf16.msra.mxu0 %v2206_v0  ;;  %v2270_v0 = vld [vmem:[#allocation9 + $0x8] sm:$0xff]  }
  0xfe   :  { %1529 = vmatpush2.bf16.msra.mxu1 %v2254_v7  ;;  %1936 = vmatprep.subr.bf16.mxu0 %v2257_v51  ;;  %v1125_v7 = vld [vmem:[%s2484_s4] sm:$0x3] }
  0xff   :  { %v1130_v10 = vrot.slane %v1125_v7, %v231_v12  ;;  %v1134_v13 = vrot.slane %v1125_v7, %v235_v14 }
 0x140   :  { %v923_v17 = vpop.f32.mrf.mxu0 }
 0x141   :  { %v964_v18 = vpop.f32.mrf.mxu1  ;;  %v924_v19 = vadd.f32 %v923_v17, %v232_v15 }
 0x142   :  { %v925_v20 = vpop.f32.mrf.mxu0 }
 0x143   :  { %v966_v21 = vpop.f32.mrf.mxu1  ;;  %v965_v8 = vadd.f32 %v964_v18, %v924_v19  ;;  %v926_v9 = vadd.f32 %v925_v20, %v236_v16 }
 0x144   :  { %v927_v22 = vpop.f32.mrf.mxu0 }
 0x145   :  { %v968_v23 = vpop.f32.mrf.mxu1  ;;  %v967_v24 = vadd.f32 %v966_v21, %v926_v9  ;;  %v1053_v25 = vmax.f32 %v965_v8, 0.0 }
 0x146   :  { %v928_v26 = vpop.f32.mrf.mxu0 }
 0x147   :  { %v969_v27 = vpop.f32.mrf.mxu1  ;;  %v1054_v28 = vmax.f32 %v967_v24, 0.0  ;;  %v1057_v30 = vpack.c.bf16 %v1053_v25, %v1053_v25 }
 0x149   :  { %v1058_v29 = vpack.c.bf16 %v1054_v28, %v1054_v28 }
 0x14b   :  { %1489 = vmatprep.mubr.bf16.mxu0 %v1058_v29 }
 0x14c   :  { %1490 = vmatmul.mubr.bf16.vlgmr.msra.gmra.mxu0 %v1057_v30 }
 0x14d   :  { %1937 = vmatpush3.bf16.msra.mxu0 %v2258_v52 }
 0x14e   :  { %1938 = vmatprep.subr.bf16.mxu0 %v2259_v53 }
 0x151   :  { %1939 = vmatpush3.bf16.msra.mxu0 %v2260_v54 }
 0x152   :  { %1940 = vmatprep.subr.bf16.mxu0 %v2261_v55 }
 0x155   :  { %1941 = vmatpush3.bf16.msra.mxu0 %v2262_v56 }
 0x156   :  { %1942 = vmatprep.subr.bf16.mxu0 %v2263_v57 }
 0x159   :  { %1943 = vmatpush3.bf16.msra.mxu0 %v2264_v58 }
 0x15a   :  { %1944 = vmatprep.subr.bf16.mxu0 %v2265_v59 }
 0x15d   :  { %1945 = vmatpush3.bf16.msra.mxu0 %v2266_v60 }
 0x15e   :  { %1946 = vmatprep.subr.bf16.mxu0 %v2267_v61 }
 0x161   :  { %1947 = vmatpush3.bf16.msra.mxu0 %v2268_v62 }
 0x162   :  { %1948 = vmatprep.subr.bf16.mxu0 %v2269_v63 }
 0x165   :  { %1949 = vmatpush3.bf16.msra.mxu0 %v2270_v0 }
 0x166   :  { %1950 = vmatprep.subr.bf16.mxu0 %v2271_v1 }
 0x169   :  { %1951 = vmatpush3.bf16.msra.mxu0 %v2272_v2 }
 0x180   :  { %v1005_v35 = vpop.f32.mrf.mxu0 }
 0x181   :  { %v1046_v36 = vpop.f32.mrf.mxu1  ;;  %v1006_v37 = vadd.f32 %v1005_v35, %v240_v33 }
 0x182   :  { %v1007_v38 = vpop.f32.mrf.mxu0 }
 0x183   :  { %v1048_v39 = vpop.f32.mrf.mxu1  ;;  %v1047_v40 = vadd.f32 %v1046_v36, %v1006_v37  ;;  %v1008_v41 = vadd.f32 %v1007_v38, %v244_v34 }
 0x184   :  { %v1009_v42 = vpop.f32.mrf.mxu0 }
 0x185   :  { %v1050_v43 = vpop.f32.mrf.mxu1  ;;  %v1049_v44 = vadd.f32 %v1048_v39, %v1008_v41  ;;  %v1055_v45 = vmax.f32 %v1047_v40, 0.0 }
 0x186   :  { %v1010_v46 = vpop.f32.mrf.mxu0 }
 0x187   :  { %v1051_v47 = vpop.f32.mrf.mxu1  ;;  %v1056_v48 = vmax.f32 %v1049_v44, 0.0  ;;  %v1059_v50 = vpack.c.bf16 %v1055_v45, %v1055_v45 }
 0x189   :  { %v1060_v49 = vpack.c.bf16 %v1056_v48, %v1056_v48 }
 0x18b   :  { %1530 = vmatprep.mubr.bf16.mxu1 %v1060_v49 }
 0x18c   :  { %1531 = vmatmul.mubr.bf16.vlgmr.msra.gmra.mxu1 %v1059_v50 }
 0x20c   :  { %v1491_v3 = vpop.f32.mrf.mxu0 }
 0x20d   :  { %v1492_v15 = vadd.f32 %v1491_v3, %v1130_v10 }
 0x20e   :  { %v1493_v4 = vpop.f32.mrf.mxu0 }
 0x20f   :  { %v1494_v17 = vadd.f32 %v1493_v4, %v1134_v13 }
 0x210   :  { %v1495_v5 = vpop.f32.mrf.mxu0 }
 0x212   :  { %v1496_v6 = vpop.f32.mrf.mxu0 }
 0x24c   :  { %v1532_v16 = vpop.f32.mrf.mxu1 }
 0x24d   :  { %v1533_v18 = vadd.f32 %v1532_v16, %v1492_v15 }
 0x24e   :  { %v1534_v19 = vpop.f32.mrf.mxu1 }
 0x24f   :  { %v1535_v20 = vadd.f32 %v1534_v19, %v1494_v17  ;;  %v1539_v21 = vmax.f32 %v1533_v18, 0.0 }
 0x250   :  { %v1536_v8 = vpop.f32.mrf.mxu1 }
 0x251   :  { %v1540_v9 = vmax.f32 %v1535_v20, 0.0  ;;  %v1541_v24 = vpack.c.bf16 %v1539_v21, %v1539_v21 }
 0x252   :  { %v1537_v22 = vpop.f32.mrf.mxu1 }
 0x253   :  { %v1542_v23 = vpack.c.bf16 %v1540_v9, %v1540_v9 }
 0x255   :  { %1710 = vmatprep.mubr.bf16.mxu0 %v1542_v23 }
 0x256   :  { %1711 = vmatmul.mubr.bf16.vlgmr.msra.gmra.mxu0 %v1541_v24 }
 0x316   :  { %v1952_v25 = vpop.f32.mrf.mxu0 }
 0x318   :  { %v1953_v12 = vpop.f32.mrf.mxu0 }
 0x319   :  { %v1954_v14 = vadd.f32 %v1953_v12, %v1952_v25 }
 0x31a   :  { %v1955_v26 = vpop.f32.mrf.mxu0 }
 0x31b   :  { %v1713_v27 = vadd.f32 %v1954_v14, %v1919_v11 }
 0x31c   :  { %v1956_v28 = vpop.f32.mrf.mxu0 }
 0x31d   :  { %v1718_v29 = vpack.c.bf16 %v1713_v27, %v1713_v27 }
 0x31f   :  { %1719 = vst [vmem:[%s2487_s7] sm:$0xf] %v1718_v29 }
 0x320   :  { %1724 = vsyncpa [#allocation3], 1 }
 0x321   :  { %1725 = vsyncpa [#allocation5], 1 }
 0x322   :  { %1726 = vsyncpa [#allocation8], 1 }

</bundles_post_ra>
